<compile_context>
chip_gen: v5e
topology: v5e:2x2
jax: 0.10.0
libtpu: 0.0.40
codegen_flags: <defaults>
</compile_context>

<pallas_src>
import math

import jax
import jax.numpy as jnp
from jax import lax
from jax.experimental import pallas as pl
from jax.experimental.pallas import tpu as pltpu


def _cdiv(a, b):
    return -(-a // b)


def _round_up(x, m):
    return _cdiv(x, m) * m


def _chip_info():
    """Return (vmem_capacity_bytes, is_multi_tensorcore_chip)."""
    cap = 128 * 1024 * 1024
    multi_tc = False
    try:
        cap = int(pltpu.get_tpu_info().vmem_capacity_bytes)
    except Exception:
        pass
    try:
        kind = jax.devices()[0].device_kind.lower()
        multi_tc = "v7" in kind          # v7x: 2 TensorCores per chip
    except Exception:
        pass
    return cap, multi_tc


def _epilogue(feats, no_imgnorm, use_abs):
    if not no_imgnorm:
        # l2norm(): X / sqrt(sum(X**2, dim=1, keepdim=True)).
        # rsqrt-multiply runs on the EUP slot instead of a full-width VALU divide;
        # it differs from x/sqrt(s) by ~1-2 ulp (well within the test tolerance).
        # No epsilon, matching the reference: a zero row yields NaN, like torch.div.
        sumsq = jnp.sum(feats * feats, axis=1, keepdims=True)
        feats = feats * lax.rsqrt(sumsq)
    if use_abs:
        feats = jnp.abs(feats)
    return feats


def _make_kernel_single(no_imgnorm, use_abs):
    """Whole reduction dim resident in VMEM: no accumulator scratch needed."""

    def kernel(x_ref, w_ref, b_ref, o_ref):
        # features = x @ W^T, contracting dim 1 of both operands so the native
        # (embed, img_dim)-layout weight is used directly (no HBM transpose).
        feats = lax.dot_general(
            x_ref[...], w_ref[...],
            dimension_numbers=(((1,), (1,)), ((), ())),
            preferred_element_type=jnp.float32)
        feats = feats + b_ref[...]                 # bias broadcast (1,E) -> (tb,E)
        o_ref[...] = _epilogue(feats, no_imgnorm, use_abs).astype(o_ref.dtype)

    return kernel


def _make_kernel_ktiled(no_imgnorm, use_abs):
    """K-tiled variant with an f32 VMEM accumulator (reduction axis is last)."""

    def kernel(x_ref, w_ref, b_ref, o_ref, acc_ref):
        k = pl.program_id(1)

        @pl.when(k == 0)
        def _init():
            acc_ref[...] = jnp.zeros_like(acc_ref)

        acc_ref[...] += lax.dot_general(
            x_ref[...], w_ref[...],
            dimension_numbers=(((1,), (1,)), ((), ())),
            preferred_element_type=jnp.float32)

        @pl.when(k == pl.num_programs(1) - 1)
        def _finalize():
            feats = acc_ref[...] + b_ref[...]
            o_ref[...] = _epilogue(feats, no_imgnorm, use_abs).astype(o_ref.dtype)

    return kernel


def _select_tiles(B, D, E_pad, itemsize, sub, tb_req, vmem_budget, multi_tc):
    """Pick (tb, grid_b, tk, weight_buffer_count) so resident blocks fit the budget."""
    bias_bytes = E_pad * 4                         # bias kept in f32, constant block

    def fits(tb_, tk_, w_bufs=2):
        vmem = (2 * tb_ * tk_ * itemsize           # x blocks (double-buffered)
                + w_bufs * E_pad * tk_ * itemsize  # weight blocks
                + bias_bytes                       # bias (constant index, tiny)
                + 2 * tb_ * E_pad * itemsize)      # output blocks
        if tk_ != D:
            vmem += tb_ * E_pad * 4                # f32 accumulator scratch
        return vmem <= vmem_budget

    # Batch tile: fill the MXU M dimension, rebalanced to the real batch.
    tb = min(_round_up(tb_req, sub), _round_up(B, sub))
    grid_b = _cdiv(B, tb)
    tb = _round_up(_cdiv(B, grid_b), sub)

    # Reduction (K) tile: prefer the full-D resident weight (fetched exactly once);
    # under VMEM pressure shrink tk first, keeping tb large so the weight is not
    # re-streamed from HBM once per batch tile (the binding cost in this GEMM).
    tk_options = [D] + [t for t in (2048, 1024, 512, 256, 128) if t < D]
    tk = None
    for cand in tk_options:
        if fits(tb, cand):
            tk = cand
            break
    if tk is None:
        # Last resort: halve tb (accepting weight re-streaming), re-checking each time.
        # TODO(synk): an embed (output-N) grid axis would keep tb large here, but it
        # complicates the row-wise L2 norm; vmem_limit_bytes still caps compilation.
        while tb > sub and tk is None:
            tb = max(sub, _round_up(tb // 2, sub))
            for cand in tk_options:
                if fits(tb, cand):
                    tk = cand
                    break
        if tk is None:
            tb, tk = sub, tk_options[-1]
    grid_b = _cdiv(B, tb)

    # v7x only (2 TCs): split a single batch tile across cores, but only when the
    # weight stays fully VMEM-resident and each half still fills the MXU M dimension.
    if multi_tc and grid_b == 1 and tk == D and B >= 2 * 128:
        grid_b = 2
        tb = _round_up(_cdiv(B, 2), sub)

    # v5e/v6e with K-tiling: triple-buffer the (dominant) weight DMA if it fits.
    w_bufs = 2
    if tk != D and not multi_tc and fits(tb, tk, w_bufs=3):
        w_bufs = 3

    return tb, grid_b, tk, w_bufs


def encoder_image_precomp(images, weight, bias, *, no_imgnorm=False, use_abs=False,
                          tb=256, compute_dtype=None):
    """features = l2norm(images @ weight.T + bias), optionally abs / no norm.

    images: (B, img_dim); weight: (embed_size, img_dim); bias: (embed_size,).
    compute_dtype: opt-in reduced-precision matmul inputs (e.g. jnp.bfloat16);
    accumulation stays f32.  Numerics-affecting, off by default.
    """
    B, D = images.shape
    E, Dw = weight.shape
    assert D == Dw, "weight/img_dim mismatch"
    assert bias.shape == (E,)

    x = images
    w = weight                                     # kept as (E, D): no transpose
    if compute_dtype is not None:
        x = x.astype(compute_dtype)
        w = w.astype(compute_dtype)

    itemsize = jnp.dtype(x.dtype).itemsize
    sub = 16 if itemsize == 2 else 8               # sublane multiple (bf16 packs 2 rows)

    # Lane-dense output: always pad embed dim to a multiple of 128 (zero columns
    # contribute nothing to the row norms and are sliced off afterwards).
    E_pad = _round_up(E, 128)

    cap, multi_tc = _chip_info()
    vmem_limit = int(min(100 * 1024 * 1024, cap * 7 // 8))
    tb, grid_b, tk, w_bufs = _select_tiles(
        B, D, E_pad, itemsize, sub, tb, vmem_limit * 7 // 8, multi_tc)

    B_pad = tb * grid_b
    D_pad = D if tk == D else _round_up(D, tk)
    nk = 1 if tk == D else D_pad // tk

    if (B_pad, D_pad) != (B, D):
        x = jnp.pad(x, ((0, B_pad - B), (0, D_pad - D)))
    if (E_pad, D_pad) != (E, D):
        w = jnp.pad(w, ((0, E_pad - E), (0, D_pad - D)))
    b2 = bias.astype(jnp.float32)
    if E_pad != E:
        b2 = jnp.pad(b2, (0, E_pad - E))
    b2 = b2.reshape(1, E_pad)

    out_dtype = images.dtype

    if nk == 1:
        # Full reduction dim resident: single-axis grid, no accumulator scratch.
        kernel = _make_kernel_single(no_imgnorm, use_abs)
        grid = (grid_b,)
        in_specs = [
            pl.BlockSpec((tb, D_pad), lambda i: (i, 0)),      # image rows
            pl.BlockSpec((E_pad, D_pad), lambda i: (0, 0)),   # full weight (constant)
            pl.BlockSpec((1, E_pad), lambda i: (0, 0)),       # bias
        ]
        out_specs = pl.BlockSpec((tb, E_pad), lambda i: (i, 0))
        scratch_shapes = []
        dim_sem = ("parallel",)
    else:
        kernel = _make_kernel_ktiled(no_imgnorm, use_abs)
        grid = (grid_b, nk)                                   # reduction axis last
        if w_bufs == 3:
            try:
                w_spec = pl.BlockSpec((E_pad, tk), lambda i, k: (0, k),
                                      pipeline_mode=pl.Buffered(3))
            except Exception:
                w_spec = pl.BlockSpec((E_pad, tk), lambda i, k: (0, k))
        else:
            w_spec = pl.BlockSpec((E_pad, tk), lambda i, k: (0, k))
        in_specs = [
            pl.BlockSpec((tb, tk), lambda i, k: (i, k)),      # image K-slice
            w_spec,                                           # weight K-slice
            pl.BlockSpec((1, E_pad), lambda i, k: (0, 0)),    # bias
        ]
        out_specs = pl.BlockSpec((tb, E_pad), lambda i, k: (i, 0))
        scratch_shapes = [pltpu.VMEM((tb, E_pad), jnp.float32)]
        dim_sem = ("parallel", "arbitrary")

    out = pl.pallas_call(
        kernel,
        out_shape=jax.ShapeDtypeStruct((B_pad, E_pad), out_dtype),
        grid_spec=pltpu.PrefetchScalarGridSpec(
            num_scalar_prefetch=0,
            grid=grid,
            in_specs=in_specs,
            out_specs=out_specs,
            scratch_shapes=scratch_shapes),
        compiler_params=pltpu.CompilerParams(
            dimension_semantics=dim_sem,
            vmem_limit_bytes=vmem_limit),
    )(x, w, b2)

    # Padded batch rows may hold 0/0 -> NaN (l2norm of a zero row); they are sliced
    # off here and never reach the caller.
    if (B_pad, E_pad) != (B, E):
        out = out[:B, :E]
    return out


def _reference(images, weight, bias, *, no_imgnorm=False, use_abs=False):
    feats = images @ weight.T + bias
    if not no_imgnorm:
        norm = jnp.sqrt(jnp.sum(feats ** 2, axis=1, keepdims=True))
        feats = feats / norm
    if use_abs:
        feats = jnp.abs(feats)
    return feats


if __name__ == "__main__":
    B, img_dim, embed_size = 16, 32, 32

    key = jax.random.PRNGKey(0)
    k_img, k_w = jax.random.split(key)

    images = jax.random.normal(k_img, (B, img_dim), dtype=jnp.float32)

    # Xavier init matching init_weights(): uniform(-r, r), r = sqrt(6)/sqrt(in+out)
    r = math.sqrt(6.0) / math.sqrt(img_dim + embed_size)
    weight = jax.random.uniform(k_w, (embed_size, img_dim),
                                dtype=jnp.float32, minval=-r, maxval=r)
    bias = jnp.zeros((embed_size,), dtype=jnp.float32)

    # Default path: fc + l2norm
    out = jax.block_until_ready(encoder_image_precomp(images, weight, bias))
    ref = _reference(images, weight, bias)
    assert out.shape == ref.shape
    assert jnp.allclose(out, ref, atol=1e-5, rtol=1e-5), "mismatch vs reference"

    # use_abs / no_imgnorm path
    out2 = jax.block_until_ready(
        encoder_image_precomp(images, weight, bias, use_abs=True, no_imgnorm=True))
    ref2 = _reference(images, weight, bias, use_abs=True, no_imgnorm=True)
    assert jnp.allclose(out2, ref2, atol=1e-5, rtol=1e-5), "mismatch (abs/no-norm)"

    # Opt-in bf16 compute path (f32 accumulation) — loose tolerance sanity check.
    out3 = jax.block_until_ready(
        encoder_image_precomp(images, weight, bias, compute_dtype=jnp.bfloat16))
    assert jnp.allclose(out3.astype(jnp.float32), ref, atol=5e-2, rtol=5e-2), \
        "mismatch (bf16 path)"

    print("KERNEL_OK")
</pallas_src>

<mosaic_0001>
module attributes {stable_mosaic.version = 11 : i64} {
  func.func @kernel(%arg0: i32, %arg1: memref<16x32xf32, #tpu.memory_space<vmem>>, %arg2: memref<128x32xf32, #tpu.memory_space<vmem>>, %arg3: memref<1x128xf32, #tpu.memory_space<vmem>>, %arg4: memref<16x128xf32, #tpu.memory_space<vmem>>) attributes {dimension_semantics = [#tpu.dimension_semantics<parallel>], iteration_bounds = array<i64: 1>, scalar_prefetch = 0 : i64, scratch_operands = 0 : i64, tpu.core_type = #tpu.core_type<tc>, window_params = [{transform_indices = @transform_0, window_bounds = array<i64: 16, 32>}, {pipeline_mode = #tpu.pipeline_mode<synchronous>, transform_indices = @transform_1, window_bounds = array<i64: 128, 32>}, {pipeline_mode = #tpu.pipeline_mode<synchronous>, transform_indices = @transform_2, window_bounds = array<i64: 1, 128>}, {transform_indices = @transform_3, window_bounds = array<i64: 16, 128>}]} {
    %c0 = arith.constant 0 : index
    %c0_0 = arith.constant 0 : index
    %0 = vector.load %arg1[%c0, %c0_0] : memref<16x32xf32, #tpu.memory_space<vmem>>, vector<16x32xf32>
    %c0_1 = arith.constant 0 : index
    %c0_2 = arith.constant 0 : index
    %1 = vector.load %arg2[%c0_1, %c0_2] : memref<128x32xf32, #tpu.memory_space<vmem>>, vector<128x32xf32>
    %cst = arith.constant dense<0.000000e+00> : vector<16x128xf32>
    %2 = tpu.matmul %0, %1, %cst {dimension_numbers = #tpu.dot_dimension_numbers<[1], [1], [0], [0], [0, 0, 1, 0], [], []>} : vector<16x32xf32>, vector<128x32xf32>, vector<16x128xf32> -> vector<16x128xf32>
    %c0_3 = arith.constant 0 : index
    %c0_4 = arith.constant 0 : index
    %3 = vector.load %arg3[%c0_3, %c0_4] : memref<1x128xf32, #tpu.memory_space<vmem>>, vector<1x128xf32>
    %4 = vector.broadcast %3 : vector<1x128xf32> to vector<16x128xf32>
    %5 = arith.addf %2, %4 : vector<16x128xf32>
    %6 = arith.mulf %5, %5 : vector<16x128xf32>
    %cst_5 = arith.constant dense<0.000000e+00> : vector<16xf32>
    %7 = vector.multi_reduction <add>, %6, %cst_5 [1] : vector<16x128xf32> to vector<16xf32>
    %8 = vector.shape_cast %7 : vector<16xf32> to vector<16x1xf32>
    %9 = math.rsqrt %8 : vector<16x1xf32>
    %10 = vector.broadcast %9 : vector<16x1xf32> to vector<16x128xf32>
    %11 = arith.mulf %5, %10 : vector<16x128xf32>
    %c0_6 = arith.constant 0 : index
    %c0_7 = arith.constant 0 : index
    %12 = vector.load %arg4[%c0_6, %c0_7] : memref<16x128xf32, #tpu.memory_space<vmem>>, vector<16x128xf32>
    tpu.vector_store %arg4[%c0_6, %c0_7], %11 {strides = array<i32>} : memref<16x128xf32, #tpu.memory_space<vmem>>, vector<16x128xf32>,
    return
  }
  func.func @transform_0(%arg0: i32) -> (i32, i32) {
    %c0_i32 = arith.constant 0 : i32
    %c0_i32_0 = arith.constant 0 : i32
    return %arg0, %c0_i32 : i32, i32
  }
  func.func @transform_1(%arg0: i32) -> (i32, i32) {
    %c0_i32 = arith.constant 0 : i32
    %c0_i32_0 = arith.constant 0 : i32
    %c0_i32_1 = arith.constant 0 : i32
    return %c0_i32, %c0_i32_0 : i32, i32
  }
  func.func @transform_2(%arg0: i32) -> (i32, i32) {
    %c0_i32 = arith.constant 0 : i32
    %c0_i32_0 = arith.constant 0 : i32
    %c0_i32_1 = arith.constant 0 : i32
    return %c0_i32, %c0_i32_0 : i32, i32
  }
  func.func @transform_3(%arg0: i32) -> (i32, i32) {
    %c0_i32 = arith.constant 0 : i32
    %c0_i32_0 = arith.constant 0 : i32
    return %arg0, %c0_i32 : i32, i32
  }
}

</mosaic_0001>

<bundles_post_ra>
// kernel: tpu_custom_call.1
= control target key start
LH: loop header
LB: loop body
LE: loop exit
PB: predicated region body
PF: predicated region fallthrough
CT: control target
= control target key end

     0   :  { %vm37_vm0 = vcmask 261120   ;;  %s348_s0 = inlined_call_operand.vmem [shape: f32[16,32], index: 0, kind: input, shape index: {}]   ;;  %s349_s1 = inlined_call_operand.vmem [shape: f32[128,32], index: 1, kind: input, shape index: {}]   ;;  %s350_s2 = inlined_call_operand.vmem [shape: f32[1,128], index: 2, kind: input, shape index: {}]   ;;  %s351_s3 = inlined_call_operand.hbm [shape: f32[16,128], index: 3, kind: output, shape index: {}]  }
   0x1   :  { %v32_v0 = vld [vmem:[%s349_s1 + $0x78] sm:$0xff]  ;;  %v31_v1 = vld [vmem:[%s349_s1 + $0x70] sm:$0xff] }
   0x2   :  { %163 = vmatpush.xpose.msk.msra.mxu0 %vm37_vm0, %v32_v0  ;;  %181 = vmatpush.xpose.msk.msra.mxu1 %vm37_vm0, %v32_v0 }
   0x3   :  { %8 = vsyncpa [#allocation3], 0  ;;  %v30_v2 = vld [vmem:[%s349_s1 + $0x68] sm:$0xff]  ;;  %v29_v3 = vld [vmem:[%s349_s1 + $0x60] sm:$0xff]  ;;  %s151_s24 = sshll.u32 %s351_s3, 4  ;;  %s232_s25 = smov 128   ;;  %s152_s24 = int_to_ptr.hbm [resolvable:$true] %s151_s24 }
   0x4   :  { %v28_v4 = vld [vmem:[%s349_s1 + $0x58] sm:$0xff]  ;;  %v27_v5 = vld [vmem:[%s349_s1 + $0x50] sm:$0xff]  ;;  %v26_v6 = vld [vmem:[%s349_s1 + $0x48] sm:$0xff]  ;;  %s233_s26 = smov 8  }
   0x5   :  { %v25_v7 = vld [vmem:[%s349_s1 + $0x40] sm:$0xff]  ;;  %v24_v8 = vld [vmem:[%s349_s1 + $0x38] sm:$0xff]  ;;  %v23_v9 = vld [vmem:[%s349_s1 + $0x30] sm:$0xff] }
   0x6   :  { %164 = vmatpush.xpose.msk.msra.mxu0 %vm37_vm0, %v31_v1  ;;  %182 = vmatpush.xpose.msk.msra.mxu1 %vm37_vm0, %v31_v1  ;;  %v22_v10 = vld [vmem:[%s349_s1 + $0x28] sm:$0xff]  ;;  %v21_v11 = vld [vmem:[%s349_s1 + $0x20] sm:$0xff]  ;;  %v20_v12 = vld [vmem:[%s349_s1 + $0x18] sm:$0xff] }
   0x7   :  { %v19_v13 = vld [vmem:[%s349_s1 + $0x10] sm:$0xff]  ;;  %v18_v14 = vld [vmem:[%s349_s1 + $0x8] sm:$0xff]  ;;  %v17_v15 = vld [vmem:[%s349_s1] sm:$0xff] }
   0x8   :  { %v15_v16 = vld [vmem:[%s348_s0] sm:$0xff]  ;;  %v16_v17 = vld [vmem:[%s348_s0 + $0x8] sm:$0xff]  ;;  %s231_s0 = smov [#allocation2]  }
   0x9   :  { %v200_v18 = vld [vmem:[%s350_s2] ss:$0 sm:$0xff]  ;;  %s149_s1 = sshll.u32 %s231_s0, 4  ;;  %s150_s1 = int_to_ptr.vmem [resolvable:$true] %s149_s1 }
   0xa   :  { %165 = vmatpush.xpose.msk.msra.mxu0 %vm37_vm0, %v30_v2  ;;  %183 = vmatpush.xpose.msk.msra.mxu1 %vm37_vm0, %v30_v2 }
   0xe   :  { %166 = vmatpush.xpose.msk.msra.mxu0 %vm37_vm0, %v29_v3  ;;  %184 = vmatpush.xpose.msk.msra.mxu1 %vm37_vm0, %v29_v3 }
  0x12   :  { %167 = vmatpush.xpose.msk.msra.mxu0 %vm37_vm0, %v28_v4  ;;  %185 = vmatpush.xpose.msk.msra.mxu1 %vm37_vm0, %v28_v4 }
  0x16   :  { %168 = vmatpush.xpose.msk.msra.mxu0 %vm37_vm0, %v27_v5  ;;  %186 = vmatpush.xpose.msk.msra.mxu1 %vm37_vm0, %v27_v5 }
  0x1a   :  { %169 = vmatpush.xpose.msk.msra.mxu0 %vm37_vm0, %v26_v6  ;;  %187 = vmatpush.xpose.msk.msra.mxu1 %vm37_vm0, %v26_v6 }
  0x1e   :  { %170 = vmatpush.xpose.msk.msra.mxu0 %vm37_vm0, %v25_v7  ;;  %188 = vmatpush.xpose.msk.msra.mxu1 %vm37_vm0, %v25_v7 }
  0x22   :  { %171 = vmatpush.xpose.msk.msra.mxu0 %vm37_vm0, %v24_v8  ;;  %189 = vmatpush.xpose.msk.msra.mxu1 %vm37_vm0, %v24_v8 }
  0x26   :  { %172 = vmatpush.xpose.msk.msra.mxu0 %vm37_vm0, %v23_v9  ;;  %190 = vmatpush.xpose.msk.msra.mxu1 %vm37_vm0, %v23_v9 }
  0x2a   :  { %173 = vmatpush.xpose.msk.msra.mxu0 %vm37_vm0, %v22_v10  ;;  %191 = vmatpush.xpose.msk.msra.mxu1 %vm37_vm0, %v22_v10 }
  0x2e   :  { %174 = vmatpush.xpose.msk.msra.mxu0 %vm37_vm0, %v21_v11  ;;  %192 = vmatpush.xpose.msk.msra.mxu1 %vm37_vm0, %v21_v11 }
  0x32   :  { %175 = vmatpush.xpose.msk.msra.mxu0 %vm37_vm0, %v20_v12  ;;  %193 = vmatpush.xpose.msk.msra.mxu1 %vm37_vm0, %v20_v12 }
  0x36   :  { %176 = vmatpush.xpose.msk.msra.mxu0 %vm37_vm0, %v19_v13  ;;  %194 = vmatpush.xpose.msk.msra.mxu1 %vm37_vm0, %v19_v13 }
  0x3a   :  { %177 = vmatpush.xpose.msk.msra.mxu0 %vm37_vm0, %v18_v14  ;;  %195 = vmatpush.xpose.msk.msra.mxu1 %vm37_vm0, %v18_v14 }
  0x3e   :  { %178 = vmatpush.xpose.msk.msra.mxu0 %vm37_vm0, %v17_v15  ;;  %196 = vmatpush.xpose.msk.msra.mxu1 %vm37_vm0, %v17_v15 }
  0x41   :  { %179 = vmatmul.msk.f32.vlgmr.msra.gmra.mxu0 %vm37_vm0, %v15_v16  ;;  %180 = vmatmul.msk.f32.vlgmr.msra.gmra.mxu1 %vm37_vm0, %v16_v17 }
  0xbe   :  { %v109_v19 = vpop.f32.mrf.mxu0  ;;  %v112_v21 = vpop.f32.mrf.mxu1 }
  0xbf   :  { %v110_v20 = vadd.f32 %v200_v18, %v109_v19  ;;  %v113_v23 = vadd.f32 %v200_v18, %v112_v21 }
  0xc1   :  { %v115_v22 = vmul.f32 %v110_v20, %v110_v20  ;;  %v116_v24 = vmul.f32 %v113_v23, %v113_v23 }
  0xc3   :  { %117 = vadd.xlane.f32.xlu0 %v115_v22 }
  0xcb   :  { %119 = vadd.xlane.f32.xlu0 %v116_v24 }
 0x136   :  { %v118_v25 = vpop.xlane.xlu0 %117 }
 0x137   :  { %201 = vrsqrt.f32 %v118_v25  ;;  %vm127_vm2 = vweird.f32 %v118_v25 }
 0x13d   :  { %v202_v26 = vpop.eup %201 }
 0x13e   :  { %v122_v27 = vmul.f32 %v202_v26, %v118_v25  ;;  %v120_v28 = vpop.xlane.xlu0 %119  ;;  %vm128_vm1 = vweird.f32 %v202_v26 }
 0x13f   :  { %203 = vrsqrt.f32 %v120_v28  ;;  %vm129_vm3 = vmor %vm127_vm2, %vm128_vm1  ;;  %vm137_vm5 = vweird.f32 %v120_v28 }
 0x140   :  { %v123_v29 = vmul.f32 %v202_v26, %v122_v27 }
 0x142   :  { %v124_v30 = vmul.f32 0.5, %v123_v29 }
 0x144   :  { %v125_v31 = vsub.f32 1.5, %v124_v30 }
 0x145   :  { %v204_v32 = vpop.eup %203 }
 0x146   :  { %v126_v33 = vmul.f32 %v202_v26, %v125_v31  ;;  %v132_v34 = vmul.f32 %v204_v32, %v120_v28  ;;  %vm138_vm4 = vweird.f32 %v204_v32 }
 0x147   :  { %vm139_vm6 = vmor %vm137_vm5, %vm138_vm4 }
 0x148   :  { %v130_v35 = vsel %vm129_vm3, %v202_v26, %v126_v33  ;;  %v133_v36 = vmul.f32 %v204_v32, %v132_v34 }
 0x149   :  { %v141_v37 = vmul.f32 %v130_v35, %v110_v20 }
 0x14a   :  { %v134_v38 = vmul.f32 0.5, %v133_v36 }
 0x14b   :  { %143 = vst [vmem:[#allocation2] sm:$0xff] %v141_v37 }
 0x14c   :  { %v135_v39 = vsub.f32 1.5, %v134_v38 }
 0x14e   :  { %v136_v40 = vmul.f32 %v204_v32, %v135_v39 }
 0x150   :  { %v140_v41 = vsel %vm139_vm6, %v204_v32, %v136_v40 }
 0x151   :  { %v142_v42 = vmul.f32 %v140_v41, %v113_v23 }
 0x153   :  { %144 = vst [vmem:[#allocation2 + $0x8] sm:$0xff] %v142_v42 }
 0x154   :  { %157 = dma.vmem_to_hbm [thread:$0]  %s150_s1, 256, %s152_s24, [#allocation3], %s232_s25, %s232_s25, %s233_s26  }
 0x155   :  { %229 = dma.done.wait [#allocation3], 256  }
 0x156   :  { %230 = vsyncadd [#allocation3], 4294967040 }
 0x157   :  { %162 = vsyncpa [#allocation3], 1 }

</bundles_post_ra>
